<compile_context>
chip_gen: v7x
topology: tpu7x:2x2x1
jax: 0.10.0
libtpu: 0.0.40
codegen_flags: <defaults>
</compile_context>

<pallas_src>
import jax
import jax.numpy as jnp
from jax.experimental import pallas as pl
from jax.experimental.pallas import tpu as pltpu


def _round_up(x, m):
    return (x + m - 1) // m * m


def _pick_tile(n_p, max_tile, *, min_blocks=1):
    """Largest multiple of 128 dividing n_p, <= max_tile, leaving >= min_blocks blocks."""
    best = 128
    t = 128
    while t <= min(max_tile, n_p):
        if n_p % t == 0 and n_p // t >= min_blocks:
            best = t
        t += 128
    return best


def prepare_adjacency(adj):
    """One-time preprocessing (call OUTSIDE the per-step hot path / jit).

    Pads the dense adjacency [N, N] (adj[dst, src] = #edges src->dst) to a
    multiple of 128 on both axes and stores it as int8 so the kernel streams
    half the HBM bytes of a bf16 adjacency.
    """
    n = adj.shape[0]
    if adj.shape != (n, n):
        raise ValueError("adjacency must be square [N, N]")
    # int8 storage is exact only for integer edge multiplicities <= 127.
    # (Concrete check: adjacency is expected to be a static array here.)
    max_mult = float(jnp.max(adj)) if n > 0 else 0.0
    if max_mult > 127.0:
        raise ValueError(
            f"edge multiplicity {max_mult} > 127; int8 adjacency storage is not exact")
    n_p = _round_up(n, 128)
    return jnp.zeros((n_p, n_p), jnp.int8).at[:n, :n].set(adj.astype(jnp.int8))


def gcn_kernel(a_ref, h_ref, b_ref, o_ref):
    """One (tile_m, tile_k) grid step of  out = A @ H + b.

    a_ref: (tile_m, tile_k) int8 adjacency tile.
    h_ref: (n_p, f_out_p)   bf16, VMEM-resident projected features H = X @ W^T.
    b_ref: (1, f_out_p)     f32 bias (VMEM-resident).
    o_ref: (tile_m, f_out_p) f32 output tile, resident across the K axis.
    """
    k = pl.program_id(1)

    @pl.when(k == 0)
    def _():
        # Initialize the resident output tile with the broadcast bias.
        o_ref[...] = jnp.broadcast_to(b_ref[...], o_ref.shape)

    tile_k = a_ref.shape[1]
    off = pl.multiple_of(k * tile_k, tile_k)
    h_tile = h_ref[pl.ds(off, tile_k), :]

    # int8 -> bf16 upcast on the VPU (hides under the A-tile DMA), then a
    # bf16 x bf16 MXU matmul with f32 accumulation straight into the output.
    o_ref[...] += jnp.dot(a_ref[...].astype(jnp.bfloat16), h_tile,
                          preferred_element_type=jnp.float32)


def gcn_layer(adj_i8, x, weight, bias, *, max_tile_m=2048, max_tile_k=1024):
    """out = (A @ x) @ weight.T + bias  (DGL sum-aggregation GCN layer).

    adj_i8: [n_p, n_p] int8 padded adjacency from prepare_adjacency().
    x:      [N, F_in]  f32 node features.
    weight: [F_out, F_in] nn.Linear weight;  bias: [F_out].
    returns [N, F_out] f32.
    Note: features/projection run in bf16 with f32 accumulation (intentional
    precision choice); adjacency handling is exact for multiplicities <= 127.
    """
    n, f_in = x.shape
    f_out = weight.shape[0]
    n_p = adj_i8.shape[0]
    assert adj_i8.dtype == jnp.int8 and adj_i8.shape == (n_p, n_p)
    assert n_p % 128 == 0 and n_p >= n

    f_out_p = _round_up(f_out, 128)

    # Hoisted linear layer: tiny [N, F_out] projection in plain XLA.
    h = jnp.dot(x.astype(jnp.bfloat16), weight.T.astype(jnp.bfloat16),
                preferred_element_type=jnp.float32).astype(jnp.bfloat16)
    h_p = jnp.zeros((n_p, f_out_p), jnp.bfloat16).at[:n, :f_out].set(h)
    b_p = jnp.zeros((1, f_out_p), jnp.float32).at[0, :f_out].set(
        bias.astype(jnp.float32))

    # Decoupled tiles; keep >= 2 row tiles when possible so both of v7x's
    # TensorCores get work on the "parallel" dst-row axis.
    tile_m = _pick_tile(n_p, max_tile_m, min_blocks=2 if n_p >= 256 else 1)
    tile_k = _pick_tile(n_p, max_tile_k)
    grid = (n_p // tile_m, n_p // tile_k)  # (dst-row tiles, src/K reduction tiles)

    # VMEM budget (conservative: assume double-buffering everywhere).
    vmem_need = (2 * tile_m * tile_k            # A tiles, int8
                 + 2 * n_p * f_out_p * 2        # resident H, bf16
                 + 2 * tile_m * f_out_p * 4     # output tiles, f32
                 + 2 * 8 * f_out_p * 4)         # bias
    if 2 * vmem_need > 48 * 1024 * 1024:
        raise ValueError("VMEM budget exceeded; lower max_tile_m/max_tile_k "
                         "(or switch to a streamed-H variant)")
    vmem_limit = min(max(2 * vmem_need, 32 * 1024 * 1024), 48 * 1024 * 1024)

    cost = pl.CostEstimate(
        flops=2 * n_p * n_p * f_out_p,
        transcendentals=0,
        bytes_accessed=(n_p * n_p                 # A, int8, streamed once
                        + n_p * f_out_p * 2       # H, bf16, fetched once
                        + n_p * f_out_p * 4       # out, f32
                        + f_out_p * 4),           # bias
    )

    out_p = pl.pallas_call(
        gcn_kernel,
        out_shape=jax.ShapeDtypeStruct((n_p, f_out_p), jnp.float32),
        grid_spec=pltpu.PrefetchScalarGridSpec(
            num_scalar_prefetch=0,
            grid=grid,
            in_specs=[
                # A tile: int8 in HBM, streamed.
                pl.BlockSpec((tile_m, tile_k), lambda i, k: (i, k)),
                # H: whole array, VMEM-resident (constant block index).
                pl.BlockSpec((n_p, f_out_p), lambda i, k: (0, 0)),
                # bias: VMEM-resident.
                pl.BlockSpec((1, f_out_p), lambda i, k: (0, 0)),
            ],
            out_specs=pl.BlockSpec((tile_m, f_out_p), lambda i, k: (i, 0)),
        ),
        compiler_params=pltpu.CompilerParams(
            dimension_semantics=("parallel", "arbitrary"),
            vmem_limit_bytes=vmem_limit,
        ),
        cost_estimate=cost,
    )(adj_i8, h_p, b_p)

    return out_p[:n, :f_out]


if __name__ == "__main__":
    key = jax.random.PRNGKey(0)
    k_edges, k_x, k_w, k_b = jax.random.split(key, 4)

    # Small graph: N not a multiple of 128 (exercises padding), F_in -> F_out.
    N, F_IN, F_OUT = 300, 32, 8
    NUM_EDGES = 1024

    # Deterministic random edge list -> dense (dst, src) adjacency with counts.
    src = jax.random.randint(k_edges, (NUM_EDGES,), 0, N)
    dst = jax.random.randint(jax.random.fold_in(k_edges, 1), (NUM_EDGES,), 0, N)
    adj = jnp.zeros((N, N), jnp.float32).at[dst, src].add(1.0)

    # Node features.
    x = jax.random.normal(k_x, (N, F_IN), jnp.float32)

    # nn.Linear(in_feats, out_feats) parameters (PyTorch default init bounds).
    bound = 1.0 / jnp.sqrt(jnp.float32(F_IN))
    weight = jax.random.uniform(k_w, (F_OUT, F_IN), jnp.float32, -bound, bound)
    bias = jax.random.uniform(k_b, (F_OUT,), jnp.float32, -bound, bound)

    # One-time adjacency preprocessing (outside the per-call hot path).
    adj_i8 = prepare_adjacency(adj)

    # Small tiles so the demo exercises the tiled K-reduction grid (3x3 grid of
    # 128x128 A tiles); production defaults are max_tile_m=2048, max_tile_k=1024.
    out = gcn_layer(adj_i8, x, weight, bias, max_tile_m=128, max_tile_k=128)
    out = jax.block_until_ready(out)
    assert out.shape == (N, F_OUT)

    # Precision-matched reference (bf16 A/H, f32 accumulation, f32 bias).
    h_ref = jnp.dot(x.astype(jnp.bfloat16), weight.T.astype(jnp.bfloat16),
                    preferred_element_type=jnp.float32).astype(jnp.bfloat16)
    ref = jnp.dot(adj.astype(jnp.bfloat16), h_ref,
                  preferred_element_type=jnp.float32) + bias
    assert jnp.allclose(out, ref, atol=1e-3, rtol=1e-3), \
        "mismatch vs precision-matched reference"

    # Loose sanity check vs the full-f32 semantics of the PyTorch module.
    ref_f32 = (adj @ x) @ weight.T + bias
    assert jnp.allclose(out, ref_f32, atol=0.3, rtol=0.05), \
        "mismatch vs f32 reference"

    print("KERNEL_OK")
</pallas_src>

<mosaic_0001>
module attributes {stable_mosaic.version = 11 : i64} {
  func.func @gcn_kernel(%arg0: i32, %arg1: i32, %arg2: memref<128x128xi8, #tpu.memory_space<vmem>>, %arg3: memref<384x128xbf16, #tpu.memory_space<vmem>>, %arg4: memref<1x128xf32, #tpu.memory_space<vmem>>, %arg5: memref<128x128xf32, #tpu.memory_space<vmem>>) attributes {dimension_semantics = [#tpu.dimension_semantics<parallel>, #tpu.dimension_semantics<arbitrary>], iteration_bounds = array<i64: 3, 3>, scalar_prefetch = 0 : i64, scratch_operands = 0 : i64, tpu.core_type = #tpu.core_type<tc>, window_params = [{transform_indices = @transform_0, window_bounds = array<i64: 128, 128>}, {pipeline_mode = #tpu.pipeline_mode<synchronous>, transform_indices = @transform_1, window_bounds = array<i64: 384, 128>}, {pipeline_mode = #tpu.pipeline_mode<synchronous>, transform_indices = @transform_2, window_bounds = array<i64: 1, 128>}, {transform_indices = @transform_3, window_bounds = array<i64: 128, 128>}]} {
    %c0_i32 = arith.constant 0 : i32
    %0 = arith.cmpi eq, %arg1, %c0_i32 : i32
    %1 = arith.extui %0 : i1 to i32
    %c0_i32_0 = arith.constant 0 : i32
    %2 = arith.cmpi ne, %1, %c0_i32_0 : i32
    scf.if %2 {
      %c0_7 = arith.constant 0 : index
      %c0_8 = arith.constant 0 : index
      %13 = vector.load %arg4[%c0_7, %c0_8] : memref<1x128xf32, #tpu.memory_space<vmem>>, vector<1x128xf32>
      %14 = vector.shape_cast %13 : vector<1x128xf32> to vector<1x128xf32>
      %15 = vector.broadcast %14 : vector<1x128xf32> to vector<128x128xf32>
      %c0_9 = arith.constant 0 : index
      %c0_10 = arith.constant 0 : index
      %16 = vector.load %arg5[%c0_9, %c0_10] : memref<128x128xf32, #tpu.memory_space<vmem>>, vector<128x128xf32>
      tpu.vector_store %arg5[%c0_9, %c0_10], %15 {strides = array<i32>} : memref<128x128xf32, #tpu.memory_space<vmem>>, vector<128x128xf32>,
    } else {
    }
    %c128_i32 = arith.constant 128 : i32
    %3 = arith.muli %arg1, %c128_i32 : i32
    %4 = tpu.assume_multiple %3, 128 : i32
    %5 = arith.index_cast %4 : i32 to index
    %c0 = arith.constant 0 : index
    %6 = vector.load %arg3[%5, %c0] : memref<384x128xbf16, #tpu.memory_space<vmem>>, vector<128x128xbf16>
    %c0_1 = arith.constant 0 : index
    %c0_2 = arith.constant 0 : index
    %7 = vector.load %arg5[%c0_1, %c0_2] : memref<128x128xf32, #tpu.memory_space<vmem>>, vector<128x128xf32>
    %c0_3 = arith.constant 0 : index
    %c0_4 = arith.constant 0 : index
    %8 = vector.load %arg2[%c0_3, %c0_4] : memref<128x128xi8, #tpu.memory_space<vmem>>, vector<128x128xi8>
    %9 = arith.sitofp %8 : vector<128x128xi8> to vector<128x128xbf16>
    %cst = arith.constant dense<0.000000e+00> : vector<128x128xf32>
    %10 = tpu.matmul %9, %6, %cst {dimension_numbers = #tpu.dot_dimension_numbers<[1], [0], [0], [1], [0, 0, 1, 1], [], []>} : vector<128x128xbf16>, vector<128x128xbf16>, vector<128x128xf32> -> vector<128x128xf32>
    %11 = arith.addf %7, %10 : vector<128x128xf32>
    %c0_5 = arith.constant 0 : index
    %c0_6 = arith.constant 0 : index
    %12 = vector.load %arg5[%c0_5, %c0_6] : memref<128x128xf32, #tpu.memory_space<vmem>>, vector<128x128xf32>
    tpu.vector_store %arg5[%c0_5, %c0_6], %11 {strides = array<i32>} : memref<128x128xf32, #tpu.memory_space<vmem>>, vector<128x128xf32>,
    return
  }
  func.func @transform_0(%arg0: i32, %arg1: i32) -> (i32, i32) {
    %c0_i32 = arith.constant 0 : i32
    return %arg0, %arg1 : i32, i32
  }
  func.func @transform_1(%arg0: i32, %arg1: i32) -> (i32, i32) {
    %c0_i32 = arith.constant 0 : i32
    %c0_i32_0 = arith.constant 0 : i32
    %c0_i32_1 = arith.constant 0 : i32
    return %c0_i32, %c0_i32_0 : i32, i32
  }
  func.func @transform_2(%arg0: i32, %arg1: i32) -> (i32, i32) {
    %c0_i32 = arith.constant 0 : i32
    %c0_i32_0 = arith.constant 0 : i32
    %c0_i32_1 = arith.constant 0 : i32
    return %c0_i32, %c0_i32_0 : i32, i32
  }
  func.func @transform_3(%arg0: i32, %arg1: i32) -> (i32, i32) {
    %c0_i32 = arith.constant 0 : i32
    %c0_i32_0 = arith.constant 0 : i32
    return %arg0, %c0_i32 : i32, i32
  }
}

</mosaic_0001>

<bundles_post_ra>
// kernel: tpu_custom_call.1
= control target key start
LH: loop header
LB: loop body
LE: loop exit
PB: predicated region body
PF: predicated region fallthrough
CT: control target
= control target key end

     0   :  { %s1368_s0 = inlined_call_operand.hbm [shape: s8[384,384], index: 0, kind: input, shape index: {}]   ;;  %s1369_s1 = inlined_call_operand.hbm [shape: bf16[384,128], index: 1, kind: input, shape index: {}]   ;;  %s1370_s2 = inlined_call_operand.vmem [shape: f32[1,128], index: 2, kind: input, shape index: {}]   ;;  %s1371_s3 = inlined_call_operand.hbm [shape: f32[384,128], index: 3, kind: output, shape index: {}]  }
   0x1   :  { %1383 = sst [smem:[#allocation16_spill]] %s1369_s1 }
   0x2   :  { %8 = vsyncpa [#allocation3], 0 }
   0x3   :  { %10 = vsyncpa [#allocation3 + $0x1], 0 }
   0x4   :  { %11 = vsyncpa [#allocation6], 0 }
   0x5   :  { %12 = vsyncpa [#allocation4], 0 }
   0x6   :  { %14 = vsyncpa [#allocation4 + $0x1], 0  ;;  %s1028_s12 = smov 0   ;;  %s1030_s13 = smov 0  }
   0x7   :  { %s1032_s14 = smov 0   ;;  %s1034_s15 = smov 0  }
   0x8   :  { %s1036_s16 = smov 0   ;;  %s1038_s17 = smov 0  }
   0x9   :  { %s1040_s18 = smov 0   ;;  %s1042_s19 = smov 0  }
   0xa   :  { %s1044_s20 = smov 0   ;;  %s1046_s21 = smov 0  }
   0xb   :  { %s1048_s22 = smov 0  }
   0xc LB: > { %1384 = sst [smem:[#allocation11_spill]] %s956_s12  ;;  %s588_s23 = sadd.s32 4294967295, %s996_s22   ;;  %s996_s22 = sphi %s1048_s22, %s20_s22   ;;  %s992_s21 = sphi %s1046_s21, %s1419_s21   ;;  %s988_s20 = sphi %s1044_s20, %s1418_s20   ;;  %s984_s19 = sphi %s1042_s19, %s1417_s19   ;;  %s980_s18 = sphi %s1040_s18, %s1408_s18   ;;  %s976_s17 = sphi %s1038_s17, %s1416_s17   ;;  %s972_s16 = sphi %s1036_s16, %s1415_s16   ;;  %s968_s15 = sphi %s1034_s15, %s1414_s15   ;;  %s964_s14 = sphi %s1032_s14, %s1413_s14   ;;  %s960_s13 = sphi %s1030_s13, %s1412_s13   ;;  %s956_s12 = sphi %s1028_s12, %s1411_s12  }
   0xd   : > { %1385 = sst [smem:[#allocation12_spill]] %s988_s20  ;;  %s589_s24 = sadd.s32 4294967294, %s996_s22  }
   0xe   : > { %p48_p0 = scmp.ne.s32.totalorder %s976_s17, %s972_s16  ;;  %p49_p1 = scmp.eq.s32.totalorder %s996_s22, 0 }
   0xf   : > { %p54_p2 = scmp.ne.s32.totalorder %s972_s16, %s968_s15  ;;  %p1088_p3 = scmp.eq.s32.totalorder %s588_s23, 0 }
  0x10   : > { %p1093_p4 = por %p49_p1, %p48_p0  ;;  %p119_p5 = scmp.ne.s32.totalorder %s964_s14, %s960_s13 }
  0x11   : > { %s1386_s26 = scalar_select %p1088_p3, 1, 0 }
  0x12   : > { %p1101_p6 = por %p1088_p3, %p54_p2  ;;  %p120_p7 = scmp.eq.s32.totalorder %s588_s23, 8 }
  0x13   : > { %p125_p8 = scmp.ne.s32.totalorder %s960_s13, %s956_s12  ;;  %p126_p9 = scmp.eq.s32.totalorder %s589_s24, 8 }
  0x14   : > { %s1388_s29 = scalar_select %p1101_p6, 1, 0 }
  0x15   : > { %p1107_p10 = por %p120_p7, %p119_p5  ;;  %p590_p11 = scmp.ge.s32.totalorder %s996_s22, 1 }
  0x16   : > { %p1112_p12 = por %p126_p9, %p125_p8  ;;  %p133_p13 = scmp.lt.s32.totalorder %s996_s22, 10 }
  0x17   : > { %s1389_s30 = scalar_select %p1107_p10, 1, 0 }
  0x18   : > { %s1390_s4 = scalar_select %p1112_p12, 1, 0 }
  0x19   : > { %p1117_p0 = pnand %p590_p11, %p133_p13  ;;  %s998_s6 = smov [#allocation5]  }
  0x1a   : > { %1391 = sst [smem:[#allocation13_spill]] %s1390_s4  ;;  %s145_s7 = sshll.u32 %s998_s6, 4  ;;  %s146_s7 = int_to_ptr.vmem [resolvable:$true] %s145_s7 }
  0x1b   : > { %s1392_s5 = scalar_select %p1117_p0, 1, 0 }
  0x1c   : > { %p692_p1 = pneg %p1117_p0  ;;  %p705_p2 = scmp.lt.s32.totalorder %s996_s22, 9 }
  0x1d   : > { %s1395_s1 = sld [smem:[#allocation16_spill]] }
  0x1e   : > { %p1126_p5 = pnand %p692_p1, %p1088_p3  ;;  %p1132_p7 = pnand %p705_p2, %p1093_p4 }
  0x20   : > { %s1394_s9 = scalar_select %p1132_p7, 1, 0 }
  0x21   : > { %p814_p9 = pneg %p1126_p5 }
  0x23   : > { %s812_s15 = scalar_lea.hbm %s1395_s1, 3072 }
  0x24   : > { %p813_p8 = scmp.ne.s32.totalorder %s1395_s1, %s812_s15  ;;  %p819_p1 = scmp.lt.u32.totalorder %s812_s15, %s1395_s1 }
  0x26   : > { %p815_p11 = pnand %p814_p9, %p813_p8 }
  0x28   : > { %p816_p13 = pneg %p815_p11 }
  0x2a   : > { %p821_p4 = pnand %p819_p1, %p816_p13 }
  0x2c   : > { %824 = shalt.err (!%p821_p4)
}
  0x2d   : > { %s825_s28 = scalar_lea.vmem %s146_s7, 3072  ;;  %p833_p3 = scmp.lt.s32.totalorder %s146_s7, %s146_s7 }
  0x2e   : > { %p826_p2 = scmp.ne.s32.totalorder %s146_s7, %s825_s28  ;;  %p834_p6 = scmp.lt.s32.totalorder %s825_s28, %s825_s28 }
  0x30   : > { %p828_p12 = pnand %p826_p2, %p814_p9  ;;  %p835_p0 = por %p834_p6, %p833_p3 }
  0x32   : > { %p829_p10 = pneg %p828_p12 }
  0x34   : > { %p836_p7 = pnand %p835_p0, %p829_p10 }
  0x36   : > { %839 = shalt.err (!%p836_p7)
}
  0x37   : > { %s999_s10 = smov 64   ;;  %s1000_s25 = smov 4  }
  0x38   : > { %695 = dma.hbm_to_vmem [thread:$0]  (!%p1126_p5), %s1395_s1, 3072, %s146_s7, [#allocation6], %s999_s10, %s999_s10, %s1000_s25  }
  0x39   : > { %s29_s23 = sadd.s32 1, %s988_s20  ;;  %s32_s24 = sadd.s32 1, %s992_s21 }
  0x3a   : > { %p30_p3 = scmp.ge.s32.totalorder %s29_s23, 3  ;;  %s162_s6 = sand.u32 1, %s976_s17  }
  0x3b   : > { %s593_s28 = sshll.u32 %s162_s6, 5  ;;  %s683_s8 = smul.u32 12, %s992_s21 }
  0x3c   : > { %s1421_s23 = smov (%p30_p3, %s29_s23), 0  ;;  %s1423_s24 = smov (!%p30_p3, %s32_s24), %s992_s21 }
  0x3d   : > { %1396 = sst [smem:[#allocation14_spill]] %s1421_s23  ;;  %s37_s27 = ssub.s32 %s988_s20, %s1421_s23 }
  0x3e   : > { %p34_p6 = scmp.ge.s32.totalorder %s1423_s24, 3  ;;  %s166_s4 = scalar_lea.vmem [#allocation2], %s593_s28 }
  0x3f   : > { %s175_s7 = sshll.u32 %s166_s4, 4  ;;  %s172_s10 = sadd.s32 %s988_s20, %s683_s8  ;;  %s1164_s7 = int_to_ptr.vmem [resolvable:$true] %s175_s7 }
  0x40   : > { %s1425_s24 = smov (%p34_p6, %s1423_s24), 0  ;;  %s596_s11 = sshll.u32 %s172_s10, 7 }
  0x41   : > { %1397 = sst [smem:[#allocation15_spill]] %s1425_s24  ;;  %s36_s25 = ssub.s32 %s992_s21, %s1425_s24 }
  0x42   : > { %s38_s15 = sor.u32 %s37_s27, %s36_s25  ;;  %p107_p10 = scmp.eq.s32.totalorder %s36_s25, 0 }
  0x43   : > { %p39_p12 = scmp.eq.s32.totalorder %s38_s15, 0  ;;  %s1171_s23 = scalar_lea.hbm %s1368_s0, %s596_s11 }
  0x44   : > { %s1398_s28 = sadd.s32 1, %s964_s14  ;;  %s1399_s8 = sadd.s32 1, %s976_s17 }
  0x45   : > { %s1176_s4 = scalar_select %p107_p10, %s964_s14, %s1398_s28  }
  0x46   : > { %s1181_s20 = scalar_select %p39_p12, %s976_s17, %s1399_s8  }
  0x47   : > { %s1183_s24 = scalar_lea.sflag [#allocation3], %s162_s6  ;;  %s840_s27 = scalar_lea.hbm %s1171_s23, 512 }
  0x48   : > { %p841_p0 = scmp.ne.s32.totalorder %s1171_s23, %s840_s27  ;;  %p1400_p5 = scmp.ne.s32.totalorder %s1394_s9, 0 }
  0x49   : > { %s845_s10 = scalar_lea.hbm %s1368_s0, 4608  ;;  %p846_p11 = scmp.lt.u32.totalorder %s1171_s23, %s1368_s0 }
  0x4a   : > { %p842_p7 = pneg %p1400_p5  ;;  %p847_p13 = scmp.lt.u32.totalorder %s845_s10, %s840_s27 }
  0x4b   : > { %p849_p4 = scmp.lt.u32.totalorder %s840_s27, %s1171_s23 }
  0x4c   : > { %p843_p8 = pnand %p842_p7, %p841_p0  ;;  %p848_p1 = por %p847_p13, %p846_p11 }
  0x4e   : > { %p844_p9 = pneg %p843_p8  ;;  %p850_p2 = por %p849_p4, %p848_p1 }
  0x50   : > { %p851_p3 = pnand %p850_p2, %p844_p9 }
  0x52   : > { %854 = shalt.err (!%p851_p3)
}
  0x53   : > { %s855_s6 = scalar_lea.vmem %s1164_s7, 512  ;;  %s1001_s15 = smov [#allocation2]  }
  0x54   : > { %p856_p6 = scmp.ne.s32.totalorder %s1164_s7, %s855_s6  ;;  %s860_s28 = sshll.u32 %s1001_s15, 4  ;;  %s861_s28 = int_to_ptr.vmem [resolvable:$false] %s860_s28 }
  0x55   : > { %s862_s8 = scalar_lea.vmem %s861_s28, 1024  ;;  %p863_p0 = scmp.lt.s32.totalorder %s1164_s7, %s861_s28 }
  0x56   : > { %p858_p10 = pnand %p856_p6, %p842_p7  ;;  %p864_p8 = scmp.lt.s32.totalorder %s862_s8, %s855_s6 }
  0x58   : > { %p859_p12 = pneg %p858_p10  ;;  %p865_p11 = por %p864_p8, %p863_p0 }
  0x5a   : > { %p866_p13 = pnand %p865_p11, %p859_p12 }
  0x5c   : > { %869 = shalt.err (!%p866_p13)
}
  0x5d   : > { %s1002_s27 = smov 384   ;;  %s1003_s1 = smov 128  }
  0x5e   : > { %s1004_s12 = smov 8   ;;  %p1401_p7 = scmp.ne.s32.totalorder %s1392_s5, 0 }
  0x5f   : > { %699 = dma.hbm_to_vmem [thread:$0]  (!%p1400_p5), %s1171_s23, 512, %s1164_s7, %s1183_s24, %s1002_s27, %s1003_s1, %s1004_s12  }
  0x60   : > { %187 = sbr.rel (%p1401_p7) target bundleno = 395 (0x18b), region = 32  ;;  %s189_s10 = sand.u32 (!%p1401_p7), 1, %s972_s16  }
  0x61   : > { %s598_s25 = sshll.u32 (!%p1401_p7), %s189_s10, 5  ;;  %s190_s11 = scalar_lea.sflag (!%p1401_p7), [#allocation3], %s189_s10 }
  0x62   : > { %s1214_s6 = scalar_lea.vmem (!%p1401_p7), [#allocation2], %s598_s25  ;;  %p1402_p9 = scmp.ne.s32.totalorder (!%p1401_p7), %s1388_s29, 0 }
  0x67   : > { %943 = dma.done.wait (%p1402_p9), %s190_s11, 512  }
  0x68   : > { %945 = vsyncadd (%p1402_p9), %s190_s11, 4294966784  ;;  %p1403_p1 = scmp.ne.s32.totalorder %s1386_s26, 0 }
  0x6a   : > { %947 = dma.done.wait (%p1403_p1), [#allocation6], 3072  }
  0x6b   : > { %949 = vsyncadd (%p1403_p1), [#allocation6], 4294964224  ;;  %s217_s5 = sand.u32 1, %s960_s13   ;;  %p601_p5 = scmp.ne.s32.totalorder %s980_s18, 0 }
  0x6c   : > { %s600_s9 = sshll.u32 %s217_s5, 7  ;;  %v602_v0 = vld [vmem:[%s1370_s2] ss:$0 sm:$0xff] (!%p601_p5) }
  0x6d   : > { %s1227_s23 = scalar_lea.vmem [#allocation7], %s600_s9  ;;  %226 = sbr.rel (%p601_p5) target bundleno = 118 (0x76), region = 44 }
  0x6e   : > { %234 = vst [vmem:[%s1227_s23] sm:$0xff] (!%p601_p5), %v602_v0  ;;  %235 = vst [vmem:[%s1227_s23 + $0x8] sm:$0xff] (!%p601_p5), %v602_v0 }
  0x6f   : > { %236 = vst [vmem:[%s1227_s23 + $0x10] sm:$0xff] (!%p601_p5), %v602_v0  ;;  %237 = vst [vmem:[%s1227_s23 + $0x18] sm:$0xff] (!%p601_p5), %v602_v0 }
  0x70   : > { %238 = vst [vmem:[%s1227_s23 + $0x20] sm:$0xff] (!%p601_p5), %v602_v0  ;;  %239 = vst [vmem:[%s1227_s23 + $0x28] sm:$0xff] (!%p601_p5), %v602_v0 }
  0x71   : > { %240 = vst [vmem:[%s1227_s23 + $0x30] sm:$0xff] (!%p601_p5), %v602_v0  ;;  %241 = vst [vmem:[%s1227_s23 + $0x38] sm:$0xff] (!%p601_p5), %v602_v0 }
  0x72   : > { %242 = vst [vmem:[%s1227_s23 + $0x40] sm:$0xff] (!%p601_p5), %v602_v0  ;;  %243 = vst [vmem:[%s1227_s23 + $0x48] sm:$0xff] (!%p601_p5), %v602_v0 }
  0x73   : > { %244 = vst [vmem:[%s1227_s23 + $0x50] sm:$0xff] (!%p601_p5), %v602_v0  ;;  %245 = vst [vmem:[%s1227_s23 + $0x58] sm:$0xff] (!%p601_p5), %v602_v0 }
  0x74   : > { %246 = vst [vmem:[%s1227_s23 + $0x60] sm:$0xff] %v602_v0  ;;  %247 = vst [vmem:[%s1227_s23 + $0x68] sm:$0xff] %v602_v0 }
  0x75   : > { %248 = vst [vmem:[%s1227_s23 + $0x70] sm:$0xff] %v602_v0  ;;  %249 = vst [vmem:[%s1227_s23 + $0x78] sm:$0xff] %v602_v0 }
  0x76 PF: > { %s603_s26 = sshll.u32 %s980_s18, 7  ;;  %v287_v1 = vld [vmem:[%s1214_s6] sm:$0xff]  ;;  %v289_v2 = vld [vmem:[%s1214_s6 + $0x10] sm:$0xff]  ;;  %v288_v13 = vld [vmem:[%s1214_s6 + $0x8] sm:$0xff]  ;;  %s618_s18 = sshll.u32 %s984_s19, 11 }
  0x77   : > { %s251_s29 = sshra.s32 %s603_s26, 3  ;;  %v291_v3 = vunpack.c.l.s8.bf16 %v287_v1  ;;  %v295_v4 = vunpack.c.l.s8.bf16 %v289_v2  ;;  %v290_v14 = vld [vmem:[%s1214_s6 + $0x18] sm:$0xff]  ;;  %v292_v15 = vunpack.c.h.s8.bf16 %v287_v1  ;;  %v296_v16 = vunpack.c.h.s8.bf16 %v289_v2  ;;  %v271_v23 = vld [vmem:[%s1227_s23] sm:$0xff]  ;;  %v272_v33 = vld [vmem:[%s1227_s23 + $0x8] sm:$0xff]  ;;  %s490_s8 = sshll.u32 %s1227_s23, 4  ;;  %s1297_s8 = int_to_ptr.vmem [resolvable:$true] %s490_s8 }
  0x78   : > { %s604_s15 = sshll.u32 %s251_s29, 2  ;;  %v293_v17 = vunpack.c.l.s8.bf16 %v288_v13  ;;  %v297_v18 = vunpack.c.l.s8.bf16 %v290_v14  ;;  %v294_v19 = vunpack.c.h.s8.bf16 %v288_v13  ;;  %v298_v20 = vunpack.c.h.s8.bf16 %v290_v14  ;;  %v273_v21 = vld [vmem:[%s1227_s23 + $0x10] sm:$0xff]  ;;  %v274_v27 = vld [vmem:[%s1227_s23 + $0x18] sm:$0xff]  ;;  %s1295_s1 = scalar_lea.hbm %s1371_s3, %s618_s18 }
  0x79   : > { %651 = vmatprep.mubr.bf16.mxu0 %v291_v3  ;;  %659 = vmatprep.mubr.bf16.mxu1 %v295_v4  ;;  %s1252_s28 = scalar_lea.vmem [#allocation5], %s604_s15  ;;  %v275_v47 = vld [vmem:[%s1227_s23 + $0x20] sm:$0xff]  ;;  %v276_v57 = vld [vmem:[%s1227_s23 + $0x28] sm:$0xff]  ;;  %s1307_s12 = scalar_lea.sflag [#allocation4], %s217_s5 }
  0x7a   : > { %v804_v5 = vld [vmem:[%s1252_s28] sm:$0xff]   ;;  %v805_v6 = vld [vmem:[%s1252_s28 + $0x8] sm:$0xff]   ;;  %v806_v7 = vld [vmem:[%s1252_s28 + $0x10] sm:$0xff]   ;;  %s870_s10 = scalar_lea.vmem %s1297_s8, 2048  ;;  %p1404_p2 = scmp.ne.s32.totalorder %s1389_s30, 0 }
  0x7b   : > { %635 = vmatprep.subr.bf16.mxu0 %v804_v5  ;;  %667 = vmatprep.subr.bf16.mxu1 %v804_v5  ;;  %v807_v8 = vld [vmem:[%s1252_s28 + $0x18] sm:$0xff]   ;;  %v808_v9 = vld [vmem:[%s1252_s28 + $0x20] sm:$0xff]   ;;  %v809_v10 = vld [vmem:[%s1252_s28 + $0x28] sm:$0xff]   ;;  %p871_p4 = scmp.ne.s32.totalorder %s1297_s8, %s870_s10  ;;  %s1005_s25 = smov [#allocation7]  }
  0x7c   : > { %636 = vmatpush3.bf16.msra.mxu0 %v804_v5  ;;  %675 = vmatpush3.bf16.msra.mxu1 %v804_v5  ;;  %v810_v11 = vld [vmem:[%s1252_s28 + $0x30] sm:$0xff]   ;;  %v811_v12 = vld [vmem:[%s1252_s28 + $0x38] sm:$0xff]   ;;  %v279_v24 = vld [vmem:[%s1227_s23 + $0x40] sm:$0xff]  ;;  %s874_s11 = sshll.u32 %s1005_s25, 4  ;;  %s875_s11 = int_to_ptr.vmem [resolvable:$false] %s874_s11 }
  0x7d   : > { %637 = vmatprep.subr.bf16.mxu0 %v805_v6  ;;  %668 = vmatprep.subr.bf16.mxu1 %v805_v6  ;;  %v281_v22 = vld [vmem:[%s1227_s23 + $0x50] sm:$0xff]  ;;  %v282_v28 = vld [vmem:[%s1227_s23 + $0x58] sm:$0xff]  ;;  %v280_v34 = vld [vmem:[%s1227_s23 + $0x48] sm:$0xff]  ;;  %p872_p3 = pnand %p871_p4, %p1404_p2  ;;  %s876_s6 = scalar_lea.vmem %s875_s11, 4096 }
  0x7e   : > { %v277_v45 = vld [vmem:[%s1227_s23 + $0x30] sm:$0xff]  ;;  %v283_v48 = vld [vmem:[%s1227_s23 + $0x60] sm:$0xff]  ;;  %v278_v51 = vld [vmem:[%s1227_s23 + $0x38] sm:$0xff]  ;;  %p877_p10 = scmp.lt.s32.totalorder %s1297_s8, %s875_s11  ;;  %p878_p12 = scmp.lt.s32.totalorder %s876_s6, %s870_s10 }
  0x7f   : > { %v285_v46 = vld [vmem:[%s1227_s23 + $0x70] sm:$0xff]  ;;  %v286_v52 = vld [vmem:[%s1227_s23 + $0x78] sm:$0xff]  ;;  %v284_v58 = vld [vmem:[%s1227_s23 + $0x68] sm:$0xff]  ;;  %p873_p6 = pneg %p872_p3 }
  0x80   : > { %638 = vmatpush3.bf16.msra.mxu0 %v805_v6  ;;  %676 = vmatpush3.bf16.msra.mxu1 %v805_v6  ;;  %p879_p0 = por %p878_p12, %p877_p10 }
  0x81   : > { %639 = vmatprep.subr.bf16.mxu0 %v806_v7  ;;  %669 = vmatprep.subr.bf16.mxu1 %v806_v7 }
  0x82   : > { %p880_p8 = pnand %p879_p0, %p873_p6 }
  0x84   : > { %640 = vmatpush3.bf16.msra.mxu0 %v806_v7  ;;  %677 = vmatpush3.bf16.msra.mxu1 %v806_v7 }
  0x85   : > { %641 = vmatprep.subr.bf16.mxu0 %v807_v8  ;;  %670 = vmatprep.subr.bf16.mxu1 %v807_v8 }
  0x88   : > { %642 = vmatpush3.bf16.msra.mxu0 %v807_v8  ;;  %678 = vmatpush3.bf16.msra.mxu1 %v807_v8 }
  0x89   : > { %643 = vmatprep.subr.bf16.mxu0 %v808_v9  ;;  %671 = vmatprep.subr.bf16.mxu1 %v808_v9 }
  0x8c   : > { %644 = vmatpush3.bf16.msra.mxu0 %v808_v9  ;;  %679 = vmatpush3.bf16.msra.mxu1 %v808_v9 }
  0x8d   : > { %645 = vmatprep.subr.bf16.mxu0 %v809_v10  ;;  %672 = vmatprep.subr.bf16.mxu1 %v809_v10 }
  0x90   : > { %646 = vmatpush3.bf16.msra.mxu0 %v809_v10  ;;  %680 = vmatpush3.bf16.msra.mxu1 %v809_v10 }
  0x91   : > { %647 = vmatprep.subr.bf16.mxu0 %v810_v11  ;;  %673 = vmatprep.subr.bf16.mxu1 %v810_v11 }
  0x94   : > { %648 = vmatpush3.bf16.msra.mxu0 %v810_v11  ;;  %681 = vmatpush3.bf16.msra.mxu1 %v810_v11 }
  0x95   : > { %649 = vmatprep.subr.bf16.mxu0 %v811_v12  ;;  %674 = vmatprep.subr.bf16.mxu1 %v811_v12 }
  0x98   : > { %650 = vmatpush3.bf16.msra.mxu0 %v811_v12  ;;  %682 = vmatpush3.bf16.msra.mxu1 %v811_v12 }
  0x9b   : > { %652 = vmatmul.mubr.bf16.vlgmr.msra.gmra.mrb[0].mxu0 %v292_v15  ;;  %660 = vmatmul.mubr.bf16.vlgmr.msra.gmra.mrb[0].mxu1 %v296_v16 }
  0x9c   : > { %655 = vmatprep.mubr.bf16.mxu0 %v293_v17  ;;  %663 = vmatprep.mubr.bf16.mxu1 %v297_v18 }
  0xa3   : > { %656 = vmatmul.mubr.bf16.gmra.mrb[4].mxu0 %v294_v19  ;;  %664 = vmatmul.mubr.bf16.gmra.mrb[4].mxu1 %v298_v20 }
 0x16e   : > { %v653_v25 = vpop.f32.mrb[0].mxu0  ;;  %v661_v26 = vpop.f32.mrb[0].mxu1 }
 0x16f   : > { %v446_v29 = vadd.f32 %v653_v25, %v273_v21  ;;  %v454_v30 = vadd.f32 %v661_v26, %v281_v22  ;;  %v381_v31 = vpop.f32.mrb[1].mxu0  ;;  %v413_v32 = vpop.f32.mrb[1].mxu1 }
 0x170   : > { %v444_v35 = vadd.f32 %v381_v31, %v271_v23  ;;  %v452_v36 = vadd.f32 %v413_v32, %v279_v24  ;;  %v654_v37 = vpop.f32.mrb[2].mxu0  ;;  %v662_v38 = vpop.f32.mrb[2].mxu1 }
 0x171   : > { %462 = vst [vmem:[%s1227_s23 + $0x10] sm:$0xff] %v446_v29  ;;  %470 = vst [vmem:[%s1227_s23 + $0x50] sm:$0xff] %v454_v30  ;;  %v447_v39 = vadd.f32 %v654_v37, %v274_v27  ;;  %v455_v40 = vadd.f32 %v662_v38, %v282_v28  ;;  %v384_v41 = vpop.f32.mrb[3].mxu0  ;;  %v416_v42 = vpop.f32.mrb[3].mxu1 }
 0x172   : > { %460 = vst [vmem:[%s1227_s23] sm:$0xff] %v444_v35  ;;  %468 = vst [vmem:[%s1227_s23 + $0x40] sm:$0xff] %v452_v36  ;;  %v445_v43 = vadd.f32 %v384_v41, %v272_v33  ;;  %v453_v44 = vadd.f32 %v416_v42, %v280_v34 }
 0x173   : > { %463 = vst [vmem:[%s1227_s23 + $0x18] sm:$0xff] %v447_v39  ;;  %471 = vst [vmem:[%s1227_s23 + $0x58] sm:$0xff] %v455_v40 }
 0x174   : > { %461 = vst [vmem:[%s1227_s23 + $0x8] sm:$0xff] %v445_v43  ;;  %469 = vst [vmem:[%s1227_s23 + $0x48] sm:$0xff] %v453_v44 }
 0x176   : > { %v657_v49 = vpop.f32.mrb[4].mxu0  ;;  %v665_v50 = vpop.f32.mrb[4].mxu1 }
 0x177   : > { %v450_v53 = vadd.f32 %v657_v49, %v277_v45  ;;  %v458_v54 = vadd.f32 %v665_v50, %v285_v46  ;;  %v397_v55 = vpop.f32.mrb[5].mxu0  ;;  %v429_v56 = vpop.f32.mrb[5].mxu1 }
 0x178   : > { %v448_v59 = vadd.f32 %v397_v55, %v275_v47  ;;  %v456_v60 = vadd.f32 %v429_v56, %v283_v48  ;;  %v658_v61 = vpop.f32.mrb[6].mxu0  ;;  %v666_v62 = vpop.f32.mrb[6].mxu1 }
 0x179   : > { %466 = vst [vmem:[%s1227_s23 + $0x30] sm:$0xff] %v450_v53  ;;  %474 = vst [vmem:[%s1227_s23 + $0x70] sm:$0xff] %v458_v54  ;;  %v451_v63 = vadd.f32 %v658_v61, %v278_v51  ;;  %v459_v0 = vadd.f32 %v666_v62, %v286_v52  ;;  %v400_v1 = vpop.f32.mrb[7].mxu0  ;;  %v432_v2 = vpop.f32.mrb[7].mxu1 }
 0x17a   : > { %464 = vst [vmem:[%s1227_s23 + $0x20] sm:$0xff] %v448_v59  ;;  %472 = vst [vmem:[%s1227_s23 + $0x60] sm:$0xff] %v456_v60  ;;  %v449_v3 = vadd.f32 %v400_v1, %v276_v57  ;;  %v457_v4 = vadd.f32 %v432_v2, %v284_v58 }
 0x17b   : > { %467 = vst [vmem:[%s1227_s23 + $0x38] sm:$0xff] %v451_v63  ;;  %475 = vst [vmem:[%s1227_s23 + $0x78] sm:$0xff] %v459_v0 }
 0x17c   : > { %465 = vst [vmem:[%s1227_s23 + $0x28] sm:$0xff] %v449_v3  ;;  %473 = vst [vmem:[%s1227_s23 + $0x68] sm:$0xff] %v457_v4 }
 0x17d   : > { %883 = shalt.err (!%p880_p8)
}
 0x17e   : > { %s884_s5 = scalar_lea.hbm %s1295_s1, 2048  ;;  %s888_s24 = scalar_lea.hbm %s1371_s3, 6144 }
 0x17f   : > { %p885_p11 = scmp.ne.s32.totalorder %s1295_s1, %s884_s5  ;;  %p889_p9 = scmp.lt.u32.totalorder %s1295_s1, %s1371_s3 }
 0x180   : > { %p890_p1 = scmp.lt.u32.totalorder %s888_s24, %s884_s5  ;;  %p892_p4 = scmp.lt.u32.totalorder %s884_s5, %s1295_s1 }
 0x181   : > { %p886_p13 = pnand %p885_p11, %p1404_p2 }
 0x182   : > { %p891_p5 = por %p890_p1, %p889_p9 }
 0x183   : > { %p887_p7 = pneg %p886_p13 }
 0x184   : > { %p893_p3 = por %p892_p4, %p891_p5 }
 0x186   : > { %p894_p6 = pnand %p893_p3, %p887_p7 }
 0x188   : > { %897 = shalt.err (!%p894_p6)
}
 0x189   : > { %s1006_s29 = smov 128   ;;  %s1007_s15 = smov 8  }
 0x18a   : > { %690 = dma.vmem_to_hbm [thread:$0]  (%p1404_p2), %s1297_s8, 2048, %s1295_s1, %s1307_s12, %s1006_s29, %s1006_s29, %s1007_s15  }
 0x18b PF: > { %s1405_s28 = sld [smem:[#allocation11_spill]]  ;;  %s1406_s18 = sld [smem:[#allocation13_spill]] }
 0x18c   : > { %p707_p10 = scmp.ge.s32.totalorder %s996_s22, 2 }
 0x191   : > { %s505_s19 = sand.u32 1, %s1405_s28   ;;  %p1407_p12 = scmp.ne.s32.totalorder %s1406_s18, 0 }
 0x192   : > { %s506_s27 = scalar_lea.sflag [#allocation4], %s505_s19 }
 0x193   : > { %p701_p0 = pnand %p707_p10, %p1407_p12 }
 0x195   : > { %951 = dma.done.wait (!%p701_p0), %s506_s27, 2048  }
 0x196   : > { %953 = vsyncadd (!%p701_p0), %s506_s27, 4294965248  ;;  %s20_s22 = sadd.s32 1, %s996_s22   ;;  %s1408_s18 = sld [smem:[#allocation12_spill]] }
 0x197   : > { %p17_p8 = scmp.ge.s32.totalorder %s20_s22, 11   ;;  %s1409_s30 = sld [smem:[#allocation14_spill]] }
 0x198   : > { %s1410_s8 = sld [smem:[#allocation15_spill]]  ;;  %s1411_s12 = smov %s960_s13 }
 0x199   : > { %s1412_s13 = smov %s964_s14  ;;  %s1413_s14 = smov %s1176_s4 }
 0x19a   : > { %s1414_s15 = smov %s972_s16  ;;  %s1415_s16 = smov %s976_s17 }
 0x19b   : > { %s1416_s17 = smov %s1181_s20  ;;  %s1417_s19 = smov %s992_s21 }
 0x19c   :  { %19 = sbr.rel (!%p17_p8) target bundleno = 12 (0xc), region = 86 }
 0x19d   : > { %s1418_s20 = smov %s1409_s30 }
 0x19e   : > { %s1419_s21 = smov %s1410_s8 }
 0x1a3   :  { %511 = vsyncpa [#allocation3], 1 }
 0x1a4   :  { %513 = vsyncpa [#allocation3 + $0x1], 1 }
 0x1a5   :  { %514 = vsyncpa [#allocation6], 1 }
 0x1a6   :  { %515 = vsyncpa [#allocation4], 1 }
 0x1a7   :  { %517 = vsyncpa [#allocation4 + $0x1], 1 }

</bundles_post_ra>
